<compile_context>
chip_gen: v7x
topology: tpu7x:2x2x1
jax: 0.10.0
libtpu: 0.0.40
codegen_flags: <defaults>
</compile_context>

<pallas_src>
import jax
import jax.numpy as jnp
from jax import lax
from jax.experimental import pallas as pl
from jax.experimental.pallas import tpu as pltpu


def _round_up(x, m):
    return ((x + m - 1) // m) * m


# ---------------------------------------------------------------------------
# Kernel 1: fused dual-direction graph propagation.
#   A (Up, Ip) is streamed once in (tm, tn) tiles; per sweep it produces
#     out_u           = (A    @ x_i  [+ add_u ]) * out_scale      (Up, D)
#     out_iT (slabs)  = (x_uT @ A    [+ add_iT]) * out_scale      (nj, D, tn)
#   where out_iT slab j holds columns [j*tn, (j+1)*tn) of (A^T @ x_u)^T.
# ---------------------------------------------------------------------------
def _make_fused_prop_kernel(has_adds, out_scale):
    def kernel(a_ref, xi_ref, xuT_ref, *rest):
        if has_adds:
            addu_ref, addiT_ref = rest[0], rest[1]
            ou_ref, oiT_ref = rest[2], rest[3]
        else:
            ou_ref, oiT_ref = rest[0], rest[1]

        i = pl.program_id(0)          # row (user) tile index, outer
        j = pl.program_id(1)          # col (item) tile index, inner
        ni = pl.num_programs(0)
        nj = pl.num_programs(1)

        a = a_ref[...]                # (tm, tn) bf16, fetched once, used twice

        # ---- direction 1: out_u[i] += A(i,j) @ x_i(j)   (resident over j) ----
        @pl.when(j == 0)
        def _():
            ou_ref[...] = jnp.zeros_like(ou_ref)

        ou_ref[...] += jnp.dot(a, xi_ref[...],
                               preferred_element_type=jnp.float32)

        # ---- direction 2: out_iT[j] += x_uT(i) @ A(i,j) (full-resident) ----
        # Standard lastdim/firstdim contraction: no per-step XLU transpose.
        contrib = jnp.dot(xuT_ref[...], a,
                          preferred_element_type=jnp.float32)

        @pl.when(i == 0)
        def _():
            oiT_ref[j] = contrib

        @pl.when(i != 0)
        def _():
            oiT_ref[j] += contrib

        if has_adds or out_scale != 1.0:
            @pl.when(j == nj - 1)
            def _():
                acc = ou_ref[...]
                if has_adds:
                    acc = acc + addu_ref[...]
                ou_ref[...] = acc * out_scale

            @pl.when(i == ni - 1)
            def _():
                acc = oiT_ref[j]
                if has_adds:
                    acc = acc + addiT_ref[...]
                oiT_ref[j] = acc * out_scale

    return kernel


def fused_propagate(A_p, x_i, x_uT, add_u=None, add_iT=None, *,
                    out_scale=1.0, tm, tn,
                    vmem_limit_bytes=48 * 1024 * 1024):
    """One HBM sweep of A producing both propagation directions."""
    Up, Ip = A_p.shape
    D = x_i.shape[1]
    assert Up % tm == 0 and Ip % tn == 0
    assert x_i.shape == (Ip, D) and x_uT.shape == (D, Up)
    ni, nj = Up // tm, Ip // tn
    has_adds = add_u is not None
    if has_adds:
        assert add_u.shape == (Up, D) and add_iT.shape == (D, Ip)

    in_specs = [
        pl.BlockSpec((tm, tn), lambda i, j: (i, j)),      # A tile
        pl.BlockSpec((tn, D), lambda i, j: (j, 0)),       # x_i block
        pl.BlockSpec((D, tm), lambda i, j: (0, i)),       # x_u^T block
    ]
    operands = [A_p, x_i, x_uT]
    if has_adds:
        in_specs += [pl.BlockSpec((tm, D), lambda i, j: (i, 0)),   # add_u
                     pl.BlockSpec((D, tn), lambda i, j: (0, j))]   # add_i^T
        operands += [add_u, add_iT]

    out_specs = [
        pl.BlockSpec((tm, D), lambda i, j: (i, 0)),                # out_u
        pl.BlockSpec((nj, D, tn), lambda i, j: (0, 0, 0)),         # out_i^T
    ]
    out_shape = (jax.ShapeDtypeStruct((Up, D), jnp.float32),
                 jax.ShapeDtypeStruct((nj, D, tn), jnp.float32))

    out_u, out_iT = pl.pallas_call(
        _make_fused_prop_kernel(has_adds, out_scale),
        out_shape=out_shape,
        grid_spec=pltpu.PrefetchScalarGridSpec(
            num_scalar_prefetch=0,
            grid=(ni, nj),
            in_specs=in_specs,
            out_specs=out_specs),
        compiler_params=pltpu.CompilerParams(
            # Both grid axes carry a reduction for one of the two outputs, so
            # neither may be megacore-sharded.
            dimension_semantics=("arbitrary", "arbitrary"),
            vmem_limit_bytes=vmem_limit_bytes),
    )(*operands)
    return out_u, out_iT


def _slabs_to_rows(slabs):
    """(nj, D, tn) f32 slabs of X^T -> (nj*tn, D) row-major X."""
    nj, D, tn = slabs.shape
    return jnp.transpose(slabs, (0, 2, 1)).reshape(nj * tn, D)


# ---------------------------------------------------------------------------
# Kernel 2: batched gather + dot score.
#   Per grid step: gather BB user / pos / neg rows from the HBM tables with
#   manual DMAs (issue-all, then drain-all), one vectorized mul + lane
#   reduction, lane-dense (BB, 128) stores.
# ---------------------------------------------------------------------------
def _make_score_kernel(BB):
    def kernel(u_idx, p_idx, n_idx, u_hbm, i_hbm, pos_ref, neg_ref,
               ubuf, pbuf, nbuf, sems):
        b0 = pl.program_id(0) * BB

        def row_copies(r):
            return (
                pltpu.make_async_copy(u_hbm.at[pl.ds(u_idx[b0 + r], 1)],
                                      ubuf.at[pl.ds(r, 1)], sems.at[0]),
                pltpu.make_async_copy(i_hbm.at[pl.ds(p_idx[b0 + r], 1)],
                                      pbuf.at[pl.ds(r, 1)], sems.at[1]),
                pltpu.make_async_copy(i_hbm.at[pl.ds(n_idx[b0 + r], 1)],
                                      nbuf.at[pl.ds(r, 1)], sems.at[2]),
            )

        @pl.loop(0, BB)
        def _issue(r):
            for cp in row_copies(r):
                cp.start()

        @pl.loop(0, BB)
        def _drain(r):
            for cp in row_copies(r):
                cp.wait()

        u = ubuf[...]
        pos = jnp.sum(u * pbuf[...], axis=1, keepdims=True)   # (BB, 1)
        neg = jnp.sum(u * nbuf[...], axis=1, keepdims=True)
        pos_ref[...] = jnp.broadcast_to(pos, pos_ref.shape)   # lane-dense
        neg_ref[...] = jnp.broadcast_to(neg, neg_ref.shape)

    return kernel


def lightgcn_scores(user, pos_item, neg_item, u_table, i_table, *, block=128):
    B = user.shape[0]
    D = u_table.shape[1]
    BB = int(min(block, _round_up(B, 8)))
    Bp = _round_up(B, BB)
    pad = Bp - B
    u_idx = jnp.pad(user.astype(jnp.int32), (0, pad))
    p_idx = jnp.pad(pos_item.astype(jnp.int32), (0, pad))
    n_idx = jnp.pad(neg_item.astype(jnp.int32), (0, pad))

    LANES = 128
    out_spec = pl.BlockSpec((BB, LANES), lambda b, u, p, n: (b, 0))

    pos, neg = pl.pallas_call(
        _make_score_kernel(BB),
        out_shape=(jax.ShapeDtypeStruct((Bp, LANES), jnp.float32),
                   jax.ShapeDtypeStruct((Bp, LANES), jnp.float32)),
        grid_spec=pltpu.PrefetchScalarGridSpec(
            num_scalar_prefetch=3,                 # user / pos / neg -> SMEM
            grid=(Bp // BB,),
            in_specs=[pl.BlockSpec(memory_space=pl.ANY),   # u_table in HBM
                      pl.BlockSpec(memory_space=pl.ANY)],  # i_table in HBM
            out_specs=[out_spec, out_spec],
            scratch_shapes=[pltpu.VMEM((BB, D), jnp.float32),
                            pltpu.VMEM((BB, D), jnp.float32),
                            pltpu.VMEM((BB, D), jnp.float32),
                            pltpu.SemaphoreType.DMA((3,))]),
        compiler_params=pltpu.CompilerParams(
            dimension_semantics=("parallel",)),
    )(u_idx, p_idx, n_idx, u_table, i_table)
    return pos[:B, :1], neg[:B, :1]


# ---------------------------------------------------------------------------
# LightGCN.forward equivalent
# ---------------------------------------------------------------------------
def lightgcn_forward(user, pos_item, neg_item, user_emb, item_emb, A,
                     *, max_tile=2048, score_block=128):
    U, D0 = user_emb.shape
    I, _ = item_emb.shape
    assert A.shape == (U, I)

    D = _round_up(D0, 128)
    t_u = min(max_tile, _round_up(U, 128))
    t_i = min(max_tile, _round_up(I, 128))
    Up, Ip = _round_up(U, t_u), _round_up(I, t_i)

    bf = jnp.bfloat16
    # Pad + cast ONCE; A is streamed exactly twice per forward (once/layer).
    A_p = jnp.pad(A.astype(bf), ((0, Up - U), (0, Ip - I)))
    u0 = jnp.pad(user_emb.astype(jnp.float32), ((0, Up - U), (0, D - D0)))
    i0 = jnp.pad(item_emb.astype(jnp.float32), ((0, Ip - I), (0, D - D0)))

    # ---- layer 1 (single A sweep):  u1 = A @ i0 ,  i1 = A^T @ u0 ----
    u1, i1T = fused_propagate(A_p, i0.astype(bf), u0.T.astype(bf),
                              tm=t_u, tn=t_i)
    i1 = _slabs_to_rows(i1T)                            # (Ip, D) f32

    # ---- layer 2 (single A sweep) with the 3-layer average fused ----
    #   u_avg = (A @ i1 + (u0 + u1)) / 3 ,  i_avg = (A^T @ u1 + (i0 + i1)) / 3
    u_avg, i_avgT = fused_propagate(
        A_p, i1.astype(bf), u1.T.astype(bf),
        add_u=u0 + u1, add_iT=(i0 + i1).T, out_scale=1.0 / 3.0,
        tm=t_u, tn=t_i)
    i_avg = _slabs_to_rows(i_avgT)                      # (Ip, D) f32

    return lightgcn_scores(user, pos_item, neg_item, u_avg, i_avg,
                           block=score_block)


if __name__ == "__main__":
    USER_COUNT, ITEM_COUNT, DIM, BATCH = 200, 300, 128, 20

    key = jax.random.PRNGKey(0)
    k1, k2, k3, k4, k5, k6 = jax.random.split(key, 6)

    # nn.init.normal_(mean=0, std=0.01) equivalents
    user_emb = 0.01 * jax.random.normal(k1, (USER_COUNT, DIM), jnp.float32)
    item_emb = 0.01 * jax.random.normal(k2, (ITEM_COUNT, DIM), jnp.float32)

    # deterministic synthetic degree-normalized interaction matrix
    A = (jax.random.uniform(k3, (USER_COUNT, ITEM_COUNT)) < 0.05).astype(jnp.float32)
    du = jnp.maximum(A.sum(axis=1, keepdims=True), 1.0)
    di = jnp.maximum(A.sum(axis=0, keepdims=True), 1.0)
    A = A / jnp.sqrt(du) / jnp.sqrt(di)

    user = jax.random.randint(k4, (BATCH,), 0, USER_COUNT, jnp.int32)
    pos_item = jax.random.randint(k5, (BATCH,), 0, ITEM_COUNT, jnp.int32)
    neg_item = jax.random.randint(k6, (BATCH,), 0, ITEM_COUNT, jnp.int32)

    # reference with the same bf16-input / f32-accumulate numerics
    def ref(user, pos_item, neg_item, u0, i0, A):
        A16 = A.astype(jnp.bfloat16)
        mm = lambda a, b: jnp.dot(a, b.astype(jnp.bfloat16),
                                  preferred_element_type=jnp.float32)
        i1 = mm(A16.T, u0)
        u1 = mm(A16, i0)
        i2 = mm(A16.T, u1)
        u2 = mm(A16, i1)
        u = (u0[user] + u1[user] + u2[user]) / 3.0
        i = (i0[pos_item] + i1[pos_item] + i2[pos_item]) / 3.0
        j = (i0[neg_item] + i1[neg_item] + i2[neg_item]) / 3.0
        return ((u * i).sum(axis=1, keepdims=True),
                (u * j).sum(axis=1, keepdims=True))

    rp, rn = ref(user, pos_item, neg_item, user_emb, item_emb, A)

    # exercise both the single-tile fast path and a multi-tile grid
    for mt, bb in ((2048, 128), (128, 8)):
        pos_score, neg_score = jax.block_until_ready(
            lightgcn_forward(user, pos_item, neg_item, user_emb, item_emb, A,
                             max_tile=mt, score_block=bb))
        assert pos_score.shape == (BATCH, 1) and neg_score.shape == (BATCH, 1)
        assert jnp.allclose(pos_score, rp, atol=1e-5, rtol=1e-2), \
            (mt, float(jnp.max(jnp.abs(pos_score - rp))))
        assert jnp.allclose(neg_score, rn, atol=1e-5, rtol=1e-2), \
            (mt, float(jnp.max(jnp.abs(neg_score - rn))))

    print("KERNEL_OK")
</pallas_src>

<mosaic_0001>
module attributes {stable_mosaic.version = 11 : i64} {
  func.func @kernel(%arg0: i32, %arg1: i32, %arg2: memref<256x384xbf16, #tpu.memory_space<vmem>>, %arg3: memref<384x128xbf16, #tpu.memory_space<vmem>>, %arg4: memref<128x256xbf16, #tpu.memory_space<vmem>>, %arg5: memref<256x128xf32, #tpu.memory_space<vmem>>, %arg6: memref<1x128x384xf32, #tpu.memory_space<vmem>>) attributes {dimension_semantics = [#tpu.dimension_semantics<arbitrary>, #tpu.dimension_semantics<arbitrary>], iteration_bounds = array<i64: 1, 1>, scalar_prefetch = 0 : i64, scratch_operands = 0 : i64, tpu.core_type = #tpu.core_type<tc>, window_params = [{transform_indices = @transform_0, window_bounds = array<i64: 256, 384>}, {transform_indices = @transform_1, window_bounds = array<i64: 384, 128>}, {transform_indices = @transform_2, window_bounds = array<i64: 128, 256>}, {transform_indices = @transform_3, window_bounds = array<i64: 256, 128>}, {pipeline_mode = #tpu.pipeline_mode<synchronous>, transform_indices = @transform_4, window_bounds = array<i64: 1, 128, 384>}]} {
    %c0 = arith.constant 0 : index
    %c0_0 = arith.constant 0 : index
    %0 = vector.load %arg2[%c0, %c0_0] : memref<256x384xbf16, #tpu.memory_space<vmem>>, vector<256x384xbf16>
    %c0_i32 = arith.constant 0 : i32
    %1 = arith.cmpi eq, %arg1, %c0_i32 : i32
    %2 = arith.extui %1 : i1 to i32
    %c0_i32_1 = arith.constant 0 : i32
    %3 = arith.cmpi ne, %2, %c0_i32_1 : i32
    scf.if %3 {
      %cst_15 = arith.constant 0.000000e+00 : f32
      %17 = vector.broadcast %cst_15 : f32 to vector<256x128xf32>
      %c0_16 = arith.constant 0 : index
      %c0_17 = arith.constant 0 : index
      %18 = vector.load %arg5[%c0_16, %c0_17] : memref<256x128xf32, #tpu.memory_space<vmem>>, vector<256x128xf32>
      tpu.vector_store %arg5[%c0_16, %c0_17], %17 {strides = array<i32>} : memref<256x128xf32, #tpu.memory_space<vmem>>, vector<256x128xf32>,
    } else {
    }
    %c0_2 = arith.constant 0 : index
    %c0_3 = arith.constant 0 : index
    %4 = vector.load %arg5[%c0_2, %c0_3] : memref<256x128xf32, #tpu.memory_space<vmem>>, vector<256x128xf32>
    %c0_4 = arith.constant 0 : index
    %c0_5 = arith.constant 0 : index
    %5 = vector.load %arg3[%c0_4, %c0_5] : memref<384x128xbf16, #tpu.memory_space<vmem>>, vector<384x128xbf16>
    %cst = arith.constant dense<0.000000e+00> : vector<256x128xf32>
    %6 = tpu.matmul %0, %5, %cst {dimension_numbers = #tpu.dot_dimension_numbers<[1], [0], [0], [1], [0, 0, 1, 1], [], []>} : vector<256x384xbf16>, vector<384x128xbf16>, vector<256x128xf32> -> vector<256x128xf32>
    %7 = arith.addf %4, %6 : vector<256x128xf32>
    %c0_6 = arith.constant 0 : index
    %c0_7 = arith.constant 0 : index
    %8 = vector.load %arg5[%c0_6, %c0_7] : memref<256x128xf32, #tpu.memory_space<vmem>>, vector<256x128xf32>
    tpu.vector_store %arg5[%c0_6, %c0_7], %7 {strides = array<i32>} : memref<256x128xf32, #tpu.memory_space<vmem>>, vector<256x128xf32>,
    %c0_8 = arith.constant 0 : index
    %c0_9 = arith.constant 0 : index
    %9 = vector.load %arg4[%c0_8, %c0_9] : memref<128x256xbf16, #tpu.memory_space<vmem>>, vector<128x256xbf16>
    %cst_10 = arith.constant dense<0.000000e+00> : vector<128x384xf32>
    %10 = tpu.matmul %9, %0, %cst_10 {dimension_numbers = #tpu.dot_dimension_numbers<[1], [0], [0], [1], [0, 0, 1, 1], [], []>} : vector<128x256xbf16>, vector<256x384xbf16>, vector<128x384xf32> -> vector<128x384xf32>
    %c0_i32_11 = arith.constant 0 : i32
    %11 = arith.cmpi eq, %arg0, %c0_i32_11 : i32
    %12 = arith.extui %11 : i1 to i32
    %c0_i32_12 = arith.constant 0 : i32
    %13 = arith.cmpi ne, %12, %c0_i32_12 : i32
    scf.if %13 {
      %17 = arith.index_cast %arg1 : i32 to index
      %c0_15 = arith.constant 0 : index
      %c0_16 = arith.constant 0 : index
      %18 = vector.load %arg6[%17, %c0_15, %c0_16] : memref<1x128x384xf32, #tpu.memory_space<vmem>>, vector<1x128x384xf32>
      %19 = vector.shape_cast %18 : vector<1x128x384xf32> to vector<128x384xf32>
      %20 = vector.shape_cast %10 : vector<128x384xf32> to vector<1x128x384xf32>
      tpu.vector_store %arg6[%17, %c0_15, %c0_16], %20 {strides = array<i32>} : memref<1x128x384xf32, #tpu.memory_space<vmem>>, vector<1x128x384xf32>,
    } else {
    }
    %c0_i32_13 = arith.constant 0 : i32
    %14 = arith.cmpi ne, %arg0, %c0_i32_13 : i32
    %15 = arith.extui %14 : i1 to i32
    %c0_i32_14 = arith.constant 0 : i32
    %16 = arith.cmpi ne, %15, %c0_i32_14 : i32
    scf.if %16 {
      %17 = arith.index_cast %arg1 : i32 to index
      %c0_15 = arith.constant 0 : index
      %c0_16 = arith.constant 0 : index
      %18 = vector.load %arg6[%17, %c0_15, %c0_16] : memref<1x128x384xf32, #tpu.memory_space<vmem>>, vector<1x128x384xf32>
      %19 = vector.shape_cast %18 : vector<1x128x384xf32> to vector<128x384xf32>
      %20 = arith.addf %19, %10 : vector<128x384xf32>
      %21 = arith.index_cast %arg1 : i32 to index
      %c0_17 = arith.constant 0 : index
      %c0_18 = arith.constant 0 : index
      %22 = vector.load %arg6[%21, %c0_17, %c0_18] : memref<1x128x384xf32, #tpu.memory_space<vmem>>, vector<1x128x384xf32>
      %23 = vector.shape_cast %22 : vector<1x128x384xf32> to vector<128x384xf32>
      %24 = vector.shape_cast %20 : vector<128x384xf32> to vector<1x128x384xf32>
      tpu.vector_store %arg6[%21, %c0_17, %c0_18], %24 {strides = array<i32>} : memref<1x128x384xf32, #tpu.memory_space<vmem>>, vector<1x128x384xf32>,
    } else {
    }
    return
  }
  func.func @transform_0(%arg0: i32, %arg1: i32) -> (i32, i32) {
    %c0_i32 = arith.constant 0 : i32
    return %arg0, %arg1 : i32, i32
  }
  func.func @transform_1(%arg0: i32, %arg1: i32) -> (i32, i32) {
    %c0_i32 = arith.constant 0 : i32
    %c0_i32_0 = arith.constant 0 : i32
    return %arg1, %c0_i32 : i32, i32
  }
  func.func @transform_2(%arg0: i32, %arg1: i32) -> (i32, i32) {
    %c0_i32 = arith.constant 0 : i32
    %c0_i32_0 = arith.constant 0 : i32
    return %c0_i32, %arg0 : i32, i32
  }
  func.func @transform_3(%arg0: i32, %arg1: i32) -> (i32, i32) {
    %c0_i32 = arith.constant 0 : i32
    %c0_i32_0 = arith.constant 0 : i32
    return %arg0, %c0_i32 : i32, i32
  }
  func.func @transform_4(%arg0: i32, %arg1: i32) -> (i32, i32, i32) {
    %c0_i32 = arith.constant 0 : i32
    %c0_i32_0 = arith.constant 0 : i32
    %c0_i32_1 = arith.constant 0 : i32
    %c0_i32_2 = arith.constant 0 : i32
    return %c0_i32, %c0_i32_0, %c0_i32_1 : i32, i32, i32
  }
}

</mosaic_0001>

<bundles_post_ra>
// kernel: tpu_custom_call.1
= control target key start
LH: loop header
LB: loop body
LE: loop exit
PB: predicated region body
PF: predicated region fallthrough
CT: control target
= control target key end

     0   :  { %10 = vsyncpa [#allocation3], 0  ;;  %s2388_s0 = inlined_call_operand.hbm [shape: bf16[256,384], index: 0, kind: input, shape index: {}]   ;;  %s2389_s1 = inlined_call_operand.hbm [shape: bf16[384,128], index: 1, kind: input, shape index: {}]   ;;  %s2390_s2 = inlined_call_operand.hbm [shape: bf16[128,256], index: 2, kind: input, shape index: {}]   ;;  %s2391_s3 = inlined_call_operand.hbm [shape: f32[256,128], index: 3, kind: output, shape index: {0}]   ;;  %s2392_s4 = inlined_call_operand.hbm [shape: f32[1,128,384], index: 4, kind: output, shape index: {1}]  }
   0x1   :  { %11 = vsyncpa [#allocation6], 0 }
   0x2   :  { %12 = vsyncpa [#allocation4], 0 }
   0x3   :  { %13 = vsyncpa [#allocation10], 0  ;;  %s2168_s15 = smov [#allocation5]   ;;  %s2050_s19 = scalar_lea.hbm %s2389_s1, 3072 }
   0x4   :  { %s31_s16 = sshll.u32 %s2168_s15, 4  ;;  %p2051_p0 = scmp.ne.s32.totalorder %s2389_s1, %s2050_s19  ;;  %s32_s16 = int_to_ptr.vmem [resolvable:$true] %s31_s16 }
   0x5   :  { %p2054_p1 = scmp.lt.u32.totalorder %s2050_s19, %s2389_s1 }
   0x7   :  { %p2056_p2 = pnand %p2054_p1, %p2051_p0 }
   0x9   :  { %2059 = shalt.err (!%p2056_p2)
}
   0xa   :  { %s2060_s24 = scalar_lea.vmem %s32_s16, 3072  ;;  %p2065_p4 = scmp.lt.s32.totalorder %s32_s16, %s32_s16 }
   0xb   :  { %p2061_p3 = scmp.ne.s32.totalorder %s32_s16, %s2060_s24  ;;  %p2066_p5 = scmp.lt.s32.totalorder %s2060_s24, %s2060_s24 }
   0xd   :  { %p2067_p6 = por %p2066_p5, %p2065_p4 }
   0xf   :  { %p2068_p7 = pnand %p2067_p6, %p2061_p3 }
  0x11   :  { %2071 = shalt.err (!%p2068_p7)
}
  0x12   :  { %s2169_s25 = smov 64   ;;  %s2170_s26 = smov 4  }
  0x13   :  { %37 = dma.hbm_to_vmem [thread:$0]  %s2389_s1, 3072, %s32_s16, [#allocation6], %s2169_s25, %s2169_s25, %s2170_s26  }
  0x14   :  { %s2171_s29 = smov [#allocation2]   ;;  %s2072_s7 = scalar_lea.hbm %s2388_s0, 6144 }
  0x15   :  { %s19_s30 = sshll.u32 %s2171_s29, 4  ;;  %p2073_p8 = scmp.ne.s32.totalorder %s2388_s0, %s2072_s7  ;;  %s20_s30 = int_to_ptr.vmem [resolvable:$true] %s19_s30 }
  0x16   :  { %p2076_p9 = scmp.lt.u32.totalorder %s2072_s7, %s2388_s0 }
  0x18   :  { %p2078_p10 = pnand %p2076_p9, %p2073_p8 }
  0x1a   :  { %2081 = shalt.err (!%p2078_p10)
}
  0x1b   :  { %s2082_s12 = scalar_lea.vmem %s20_s30, 6144  ;;  %p2087_p12 = scmp.lt.s32.totalorder %s20_s30, %s20_s30 }
  0x1c   :  { %p2083_p11 = scmp.ne.s32.totalorder %s20_s30, %s2082_s12  ;;  %p2088_p13 = scmp.lt.s32.totalorder %s2082_s12, %s2082_s12 }
  0x1e   :  { %p2089_p0 = por %p2088_p13, %p2087_p12 }
  0x20   :  { %p2090_p1 = pnand %p2089_p0, %p2083_p11 }
  0x22   :  { %2093 = shalt.err (!%p2090_p1)
}
  0x23   :  { %s2172_s1 = smov 192   ;;  %s2173_s13 = smov 12  }
  0x24   :  { %25 = dma.hbm_to_vmem [thread:$0]  %s2388_s0, 6144, %s20_s30, [#allocation3], %s2172_s1, %s2172_s1, %s2173_s13  }
  0x25   :  { %s2174_s16 = smov [#allocation7]   ;;  %s2094_s20 = scalar_lea.hbm %s2390_s2, 2048 }
  0x26   :  { %s43_s17 = sshll.u32 %s2174_s16, 4  ;;  %p2095_p2 = scmp.ne.s32.totalorder %s2390_s2, %s2094_s20  ;;  %s44_s17 = int_to_ptr.vmem [resolvable:$true] %s43_s17 }
  0x27   :  { %p2098_p3 = scmp.lt.u32.totalorder %s2094_s20, %s2390_s2 }
  0x29   :  { %p2100_p4 = pnand %p2098_p3, %p2095_p2 }
  0x2b   :  { %2103 = shalt.err (!%p2100_p4)
}
  0x2c   :  { %s2104_s25 = scalar_lea.vmem %s44_s17, 2048  ;;  %p2109_p6 = scmp.lt.s32.totalorder %s44_s17, %s44_s17 }
  0x2d   :  { %p2105_p5 = scmp.ne.s32.totalorder %s44_s17, %s2104_s25  ;;  %p2110_p7 = scmp.lt.s32.totalorder %s2104_s25, %s2104_s25 }
  0x2f   :  { %p2111_p8 = por %p2110_p7, %p2109_p6 }
  0x31   :  { %p2112_p9 = pnand %p2111_p8, %p2105_p5 }
  0x33   :  { %2115 = shalt.err (!%p2112_p9)
}
  0x34   :  { %s2175_s0 = smov 128   ;;  %s2176_s26 = smov 8  }
  0x35   :  { %49 = dma.hbm_to_vmem [thread:$0]  %s2390_s2, 2048, %s44_s17, [#allocation6], %s2175_s0, %s2175_s0, %s2176_s26  }
  0x36   :  { %2160 = dma.done.wait [#allocation3], 6144  }
  0x37   :  { %2161 = vsyncadd [#allocation3], 4294961152 }
  0x38   :  { %2162 = dma.done.wait [#allocation6], 5120  }
  0x39   :  { %2163 = vsyncadd [#allocation6], 4294962176  ;;  %v1938_v0 = vld [vmem:[#allocation5 + $0x40] sm:$0xff]   ;;  %v1940_v2 = vld [vmem:[#allocation5 + $0x48] sm:$0xff]   ;;  %s2177_s2 = smov [#allocation8]  }
  0x3a   :  { %v1939_v1 = vld [vmem:[#allocation5] sm:$0xff]   ;;  %1660 = vmatprep.subr.bf16.mxu0 %v1938_v0  ;;  %1908 = vmatprep.subr.bf16.mxu1 %v1938_v0  ;;  %v1941_v3 = vld [vmem:[#allocation5 + $0x8] sm:$0xff]   ;;  %v1942_v4 = vld [vmem:[#allocation5 + $0x50] sm:$0xff]   ;;  %s1543_s29 = sshll.u32 %s2177_s2, 4  ;;  %s1544_s29 = int_to_ptr.vmem [resolvable:$true] %s1543_s29 }
  0x3b   :  { %1661 = vmatpush3.bf16.msra.mxu0 %v1939_v1  ;;  %1916 = vmatpush3.bf16.msra.mxu1 %v1939_v1  ;;  %v1943_v5 = vld [vmem:[#allocation5 + $0x10] sm:$0xff]   ;;  %v1944_v6 = vld [vmem:[#allocation5 + $0x58] sm:$0xff]   ;;  %v1946_v8 = vld [vmem:[#allocation5 + $0x60] sm:$0xff]   ;;  %s2116_s30 = scalar_lea.vmem %s1544_s29, 4096  ;;  %p2121_p11 = scmp.lt.s32.totalorder %s1544_s29, %s1544_s29 }
  0x3c   :  { %1662 = vmatprep.subr.bf16.mxu0 %v1940_v2  ;;  %1909 = vmatprep.subr.bf16.mxu1 %v1940_v2  ;;  %v1945_v7 = vld [vmem:[#allocation5 + $0x18] sm:$0xff]   ;;  %v1947_v9 = vld [vmem:[#allocation5 + $0x20] sm:$0xff]   ;;  %v1948_v10 = vld [vmem:[#allocation5 + $0x68] sm:$0xff]   ;;  %p2117_p10 = scmp.ne.s32.totalorder %s1544_s29, %s2116_s30  ;;  %p2122_p12 = scmp.lt.s32.totalorder %s2116_s30, %s2116_s30 }
  0x3d   :  { %v2245_v11 = vld [vmem:[#allocation2 + $0x4] ss:$12 sps:$4 sm:$0xff]   ;;  %v1949_v13 = vld [vmem:[#allocation5 + $0x28] sm:$0xff]   ;;  %v1952_v16 = vld [vmem:[#allocation5 + $0x78] sm:$0xff]  }
  0x3e   :  { %v2247_v12 = vld [vmem:[#allocation2 + $0x124] ss:$12 sps:$4 sm:$0xff]   ;;  %672 = vmatprep.mubr.bf16.mxu0 %v2245_v11  ;;  %v1953_v17 = vld [vmem:[#allocation5 + $0x38] sm:$0xff]   ;;  %v2251_v19 = vld [vmem:[#allocation2 + $0xc8] ss:$12 sps:$4 sm:$0xff]   ;;  %p2123_p13 = por %p2122_p12, %p2121_p11 }
  0x3f   :  { %1663 = vmatpush3.bf16.msra.mxu0 %v1941_v3  ;;  %1917 = vmatpush3.bf16.msra.mxu1 %v1941_v3  ;;  %v1950_v14 = vld [vmem:[#allocation5 + $0x70] sm:$0xff]   ;;  %v1960_v18 = vld [vmem:[#allocation5 + $0x80] sm:$0xff]   ;;  %v1963_v23 = vld [vmem:[#allocation5 + $0x88] sm:$0xff]  }
  0x40   :  { %1664 = vmatprep.subr.bf16.mxu0 %v1942_v4  ;;  %1910 = vmatprep.subr.bf16.mxu1 %v1942_v4  ;;  %v1951_v15 = vld [vmem:[#allocation5 + $0x30] sm:$0xff]   ;;  %v2253_v20 = vld [vmem:[#allocation2] ss:$12 sps:$4 sm:$0xff]   ;;  %v2260_v24 = vld [vmem:[#allocation2 + $0x1c] ss:$12 sps:$4 sm:$0xff]   ;;  %p2124_p0 = pnand %p2123_p13, %p2117_p10 }
  0x41   :  { %768 = vmatprep.mubr.bf16.mxu1 %v2247_v12  ;;  %v2255_v21 = vld [vmem:[#allocation2 + $0x120] ss:$12 sps:$4 sm:$0xff]   ;;  %v2257_v22 = vld [vmem:[#allocation2 + $0x8] ss:$12 sps:$4 sm:$0xff]   ;;  %v2270_v27 = vld [vmem:[#allocation2 + $0x18] ss:$12 sps:$4 sm:$0xff]  }
  0x42   :  { %v2262_v25 = vld [vmem:[#allocation2 + $0x13c] ss:$12 sps:$4 sm:$0xff]   ;;  %v2267_v26 = vld [vmem:[#allocation2 + $0xe0] ss:$12 sps:$4 sm:$0xff]   ;;  %v2272_v28 = vld [vmem:[#allocation2 + $0x138] ss:$12 sps:$4 sm:$0xff]  }
  0x43   :  { %1665 = vmatpush3.bf16.msra.mxu0 %v1943_v5  ;;  %1918 = vmatpush3.bf16.msra.mxu1 %v1943_v5  ;;  %v1970_v29 = vld [vmem:[#allocation5 + $0x90] sm:$0xff]   ;;  %v2276_v30 = vld [vmem:[#allocation2 + $0x20] ss:$12 sps:$4 sm:$0xff]   ;;  %v1971_v31 = vld [vmem:[#allocation5 + $0x98] sm:$0xff]  }
  0x44   :  { %1666 = vmatprep.subr.bf16.mxu0 %v1944_v6  ;;  %1911 = vmatprep.subr.bf16.mxu1 %v1944_v6  ;;  %v2278_v32 = vld [vmem:[#allocation2 + $0xf8] ss:$12 sps:$4 sm:$0xff]   ;;  %v2281_v33 = vld [vmem:[#allocation2 + $0x34] ss:$12 sps:$4 sm:$0xff]   ;;  %v1978_v37 = vld [vmem:[#allocation2 + $0x30] ss:$12 sps:$4 sm:$0xff]  }
  0x45   :  { %v2283_v34 = vld [vmem:[#allocation2 + $0x154] ss:$12 sps:$4 sm:$0xff]   ;;  %v1990_v36 = vld [vmem:[#allocation2 + $0x38] ss:$12 sps:$4 sm:$0xff]   ;;  %v2290_v38 = vld [vmem:[#allocation2 + $0x110] ss:$12 sps:$4 sm:$0xff]  }
  0x46   :  { %v1980_v35 = vld [vmem:[#allocation5 + $0xa0] sm:$0xff]   ;;  %v2292_v39 = vld [vmem:[#allocation2 + $0x150] ss:$12 sps:$4 sm:$0xff]   ;;  %v1981_v40 = vld [vmem:[#allocation5 + $0xa8] sm:$0xff]  }
  0x47   :  { %1667 = vmatpush3.bf16.msra.mxu0 %v1945_v7  ;;  %1919 = vmatpush3.bf16.msra.mxu1 %v1945_v7  ;;  %v1982_v41 = vld [vmem:[#allocation2 + $0x4c] ss:$12 sps:$4 sm:$0xff]   ;;  %v1996_v42 = vld [vmem:[#allocation2 + $0x50] ss:$12 sps:$4 sm:$0xff]   ;;  %v2297_v44 = vld [vmem:[#allocation2 + $0x128] ss:$12 sps:$4 sm:$0xff]  }
  0x48   :  { %1668 = vmatprep.subr.bf16.mxu0 %v1946_v8  ;;  %1912 = vmatprep.subr.bf16.mxu1 %v1946_v8  ;;  %v2295_v43 = vld [vmem:[#allocation2 + $0x16c] ss:$12 sps:$4 sm:$0xff]   ;;  %v1988_v45 = vld [vmem:[#allocation5 + $0xb0] sm:$0xff]   ;;  %v1997_v55 = vld [vmem:[#allocation2 + $0x7c] ss:$12 sps:$4 sm:$0xff]  }
  0x49   :  { %v1986_v46 = vld [vmem:[#allocation2 + $0x48] ss:$12 sps:$4 sm:$0xff]   ;;  %v2302_v48 = vld [vmem:[#allocation2 + $0x140] ss:$12 sps:$4 sm:$0xff]   ;;  %v1992_v50 = vld [vmem:[#allocation2 + $0x64] ss:$12 sps:$4 sm:$0xff]  }
  0x4a   :  { %v2002_v47 = vld [vmem:[#allocation2 + $0x68] ss:$12 sps:$4 sm:$0xff]   ;;  %v1991_v51 = vld [vmem:[#allocation5 + $0xb8] sm:$0xff]   ;;  %v2004_v53 = vld [vmem:[#allocation2 + $0x80] ss:$12 sps:$4 sm:$0xff]  }
  0x4b   :  { %1669 = vmatpush3.bf16.msra.mxu0 %v1947_v9  ;;  %1920 = vmatpush3.bf16.msra.mxu1 %v1947_v9  ;;  %v2304_v49 = vld [vmem:[#allocation2 + $0x168] ss:$12 sps:$4 sm:$0xff]   ;;  %v2308_v52 = vld [vmem:[#allocation2 + $0x158] ss:$12 sps:$4 sm:$0xff]   ;;  %v1994_v54 = vld [vmem:[#allocation2 + $0x60] ss:$12 sps:$4 sm:$0xff]  }
  0x4c   :  { %1670 = vmatprep.subr.bf16.mxu0 %v1948_v10  ;;  %1913 = vmatprep.subr.bf16.mxu1 %v1948_v10  ;;  %v2008_v56 = vld [vmem:[#allocation2 + $0x98] ss:$12 sps:$4 sm:$0xff]   ;;  %v2315_v57 = vld [vmem:[#allocation2 + $0x170] ss:$12 sps:$4 sm:$0xff]   ;;  %v2000_v60 = vld [vmem:[#allocation2 + $0x94] ss:$12 sps:$4 sm:$0xff]  }
  0x4d   :  { %v2010_v58 = vld [vmem:[#allocation2 + $0xb0] ss:$12 sps:$4 sm:$0xff]   ;;  %v1999_v59 = vld [vmem:[#allocation2 + $0x78] ss:$12 sps:$4 sm:$0xff]   ;;  %v2009_v63 = vld [vmem:[#allocation2 + $0xa8] ss:$12 sps:$4 sm:$0xff]  }
  0x4e   :  { %v2003_v61 = vld [vmem:[#allocation2 + $0x90] ss:$12 sps:$4 sm:$0xff]   ;;  %v2006_v62 = vld [vmem:[#allocation2 + $0xac] ss:$12 sps:$4 sm:$0xff]   ;;  %v2020_v4 = vld [vmem:[#allocation2 + $0xf4] ss:$12 sps:$4 sm:$0xff]  }
  0x4f   :  { %1671 = vmatpush3.bf16.msra.mxu0 %v1949_v13  ;;  %1921 = vmatpush3.bf16.msra.mxu1 %v1949_v13  ;;  %v2012_v0 = vld [vmem:[#allocation2 + $0xc4] ss:$12 sps:$4 sm:$0xff]   ;;  %v2014_v1 = vld [vmem:[#allocation2 + $0xc0] ss:$12 sps:$4 sm:$0xff]   ;;  %v2017_v2 = vld [vmem:[#allocation2 + $0xdc] ss:$12 sps:$4 sm:$0xff]  }
  0x50   :  { %1672 = vmatprep.subr.bf16.mxu0 %v1950_v14  ;;  %1914 = vmatprep.subr.bf16.mxu1 %v1950_v14  ;;  %v2015_v3 = vld [vmem:[#allocation2 + $0xd8] ss:$12 sps:$4 sm:$0xff]   ;;  %v2018_v5 = vld [vmem:[#allocation2 + $0xf0] ss:$12 sps:$4 sm:$0xff]   ;;  %v2022_v7 = vld [vmem:[#allocation2 + $0x108] ss:$12 sps:$4 sm:$0xff]  }
  0x51   :  { %v2024_v6 = vld [vmem:[#allocation2 + $0x10c] ss:$12 sps:$4 sm:$0xff]   ;;  %v2026_v9 = vld [vmem:[#allocation7] ss:$8 sps:$4 sm:$0xff]   ;;  %v2029_v10 = vld [vmem:[#allocation7 + $0x14] ss:$8 sps:$4 sm:$0xff]  }
  0x52   :  { %v2028_v8 = vld [vmem:[#allocation7 + $0x4] ss:$8 sps:$4 sm:$0xff]   ;;  %v2034_v13 = vld [vmem:[#allocation7 + $0x20] ss:$8 sps:$4 sm:$0xff]   ;;  %v2035_v14 = vld [vmem:[#allocation7 + $0x34] ss:$8 sps:$4 sm:$0xff]  }
  0x53   :  { %1673 = vmatpush3.bf16.msra.mxu0 %v1951_v15  ;;  %1922 = vmatpush3.bf16.msra.mxu1 %v1951_v15  ;;  %v2037_v15 = vld [vmem:[#allocation7 + $0x30] ss:$8 sps:$4 sm:$0xff]  }
  0x54   :  { %1674 = vmatprep.subr.bf16.mxu0 %v1952_v16  ;;  %1915 = vmatprep.subr.bf16.mxu1 %v1952_v16  ;;  %v2038_v16 = vld [vmem:[#allocation7 + $0x44] ss:$8 sps:$4 sm:$0xff]  }
  0x57   :  { %1675 = vmatpush3.bf16.msra.mxu0 %v1953_v17  ;;  %1923 = vmatpush3.bf16.msra.mxu1 %v1953_v17  ;;  %v2040_v17 = vld [vmem:[#allocation7 + $0x40] ss:$8 sps:$4 sm:$0xff]  }
  0x58   :  { %1860 = vmatprep.subr.bf16.mxu1 %v1960_v18  ;;  %1796 = vmatprep.subr.bf16.mxu0 %v2251_v19 }
  0x5a   :  { %673 = vmatmul.mubr.bf16.vlgmr.msra.gmra.mrb[0].mxu0 %v2253_v20  ;;  %769 = vmatmul.mubr.bf16.vlgmr.msra.gmra.mrb[0].mxu1 %v2255_v21 }
  0x5b   :  { %1861 = vmatpush3.bf16.msra.mxu1 %v1960_v18  ;;  %1797 = vmatpush3.bf16.msra.mxu0 %v2257_v22  ;;  %v2041_v18 = vld [vmem:[#allocation7 + $0x54] ss:$8 sps:$4 sm:$0xff]  }
  0x5c   :  { %1862 = vmatprep.subr.bf16.mxu1 %v1963_v23  ;;  %680 = vmatprep.mubr.bf16.mxu0 %v2260_v24 }
  0x5d   :  { %776 = vmatprep.mubr.bf16.mxu1 %v2262_v25  ;;  %1798 = vmatprep.subr.bf16.mxu0 %v2267_v26 }
  0x5f   :  { %1863 = vmatpush3.bf16.msra.mxu1 %v1963_v23  ;;  %1799 = vmatpush3.bf16.msra.mxu0 %v2276_v30  ;;  %v2049_v23 = vld [vmem:[#allocation7 + $0x70] ss:$8 sps:$4 sm:$0xff]  }
  0x60   :  { %1864 = vmatprep.subr.bf16.mxu1 %v1970_v29  ;;  %1800 = vmatprep.subr.bf16.mxu0 %v2278_v32 }
  0x62   :  { %681 = vmatmul.mubr.bf16.gmra.mrb[4].mxu0 %v2270_v27  ;;  %777 = vmatmul.mubr.bf16.gmra.mrb[4].mxu1 %v2272_v28 }
  0x63   :  { %1865 = vmatpush3.bf16.msra.mxu1 %v1970_v29  ;;  %688 = vmatprep.mubr.bf16.mxu0 %v2281_v33 }
  0x64   :  { %1866 = vmatprep.subr.bf16.mxu1 %v1971_v31  ;;  %784 = vmatprep.mubr.bf16.mxu1 %v2283_v34 }
  0x65   :  { %1801 = vmatpush3.bf16.msra.mxu0 %v1990_v36 }
  0x66   :  { %1802 = vmatprep.subr.bf16.mxu0 %v2290_v38 }
  0x67   :  { %1867 = vmatpush3.bf16.msra.mxu1 %v1971_v31 }
  0x68   :  { %1868 = vmatprep.subr.bf16.mxu1 %v1980_v35 }
  0x69   :  { %1803 = vmatpush3.bf16.msra.mxu0 %v1996_v42 }
  0x6a   :  { %689 = vmatmul.mubr.bf16.gmra.mrb[8].mxu0 %v1978_v37  ;;  %785 = vmatmul.mubr.bf16.gmra.mrb[8].mxu1 %v2292_v39 }
  0x6b   :  { %1869 = vmatpush3.bf16.msra.mxu1 %v1980_v35  ;;  %696 = vmatprep.mubr.bf16.mxu0 %v1982_v41 }
  0x6c   :  { %1870 = vmatprep.subr.bf16.mxu1 %v1981_v40  ;;  %792 = vmatprep.mubr.bf16.mxu1 %v2295_v43 }
  0x6d   :  { %1804 = vmatprep.subr.bf16.mxu0 %v2297_v44 }
  0x6e   :  { %1805 = vmatpush3.bf16.msra.mxu0 %v2002_v47 }
  0x6f   :  { %1871 = vmatpush3.bf16.msra.mxu1 %v1981_v40  ;;  %1806 = vmatprep.subr.bf16.mxu0 %v2302_v48 }
  0x70   :  { %1872 = vmatprep.subr.bf16.mxu1 %v1988_v45 }
  0x72   :  { %697 = vmatmul.mubr.bf16.gmra.mrb[12].mxu0 %v1986_v46  ;;  %793 = vmatmul.mubr.bf16.gmra.mrb[12].mxu1 %v2304_v49 }
  0x73   :  { %1873 = vmatpush3.bf16.msra.mxu1 %v1988_v45  ;;  %704 = vmatprep.mubr.bf16.mxu0 %v1992_v50 }
  0x74   :  { %1874 = vmatprep.subr.bf16.mxu1 %v1991_v51  ;;  %1876 = vmatprep.mubr.bf16.mxu1 %v2257_v22  ;;  %v2047_v22 = vld [vmem:[#allocation7 + $0x74] ss:$8 sps:$4 sm:$0xff]  }
  0x75   :  { %1807 = vmatpush3.bf16.msra.mxu0 %v2004_v53 }
  0x76   :  { %1808 = vmatprep.subr.bf16.mxu0 %v2308_v52 }
  0x77   :  { %1875 = vmatpush3.bf16.msra.mxu1 %v1991_v51 }
  0x78   :  { %1122 = vmatprep.subr.bf16.mxu1 %v2245_v11  ;;  %v2031_v11 = vld [vmem:[#allocation7 + $0x10] ss:$8 sps:$4 sm:$0xff]  }
  0x79   :  { %1809 = vmatpush3.bf16.msra.mxu0 %v2008_v56 }
  0x7a   :  { %705 = vmatmul.mubr.bf16.gmra.mrb[16].mxu0 %v1994_v54  ;;  %1877 = vmatmul.mubr.bf16.vlgmr.msra.gmra.mrb[16].mxu1 %v2276_v30 }
  0x7b   :  { %1123 = vmatpush1.bf16.msra.mxu1 %v2253_v20  ;;  %712 = vmatprep.mubr.bf16.mxu0 %v1997_v55  ;;  %v2044_v20 = vld [vmem:[#allocation7 + $0x64] ss:$8 sps:$4 sm:$0xff]  }
  0x7c   :  { %1124 = vmatprep.subr.bf16.mxu1 %v2260_v24  ;;  %1880 = vmatprep.mubr.bf16.mxu1 %v1990_v36 }
  0x7d   :  { %1810 = vmatprep.subr.bf16.mxu0 %v2315_v57 }
  0x7e   :  { %1811 = vmatpush3.bf16.msra.mxu0 %v2010_v58 }
  0x7f   :  { %1125 = vmatpush1.bf16.msra.mxu1 %v2270_v27 }
  0x80   :  { %1126 = vmatprep.subr.bf16.mxu1 %v2281_v33 }
  0x82   :  { %713 = vmatmul.mubr.bf16.gmra.mrb[20].mxu0 %v1999_v59  ;;  %1881 = vmatmul.mubr.bf16.gmra.mrb[20].mxu1 %v1996_v42 }
  0x83   :  { %1127 = vmatpush1.bf16.msra.mxu1 %v1978_v37  ;;  %720 = vmatprep.mubr.bf16.mxu0 %v2000_v60 }
  0x84   :  { %1128 = vmatprep.subr.bf16.mxu1 %v1982_v41  ;;  %1884 = vmatprep.mubr.bf16.mxu1 %v2002_v47 }
  0x87   :  { %1129 = vmatpush1.bf16.msra.mxu1 %v1986_v46 }
  0x88   :  { %1130 = vmatprep.subr.bf16.mxu1 %v1992_v50 }
  0x8a   :  { %721 = vmatmul.mubr.bf16.gmra.mrb[24].mxu0 %v2003_v61  ;;  %1885 = vmatmul.mubr.bf16.gmra.mrb[24].mxu1 %v2004_v53 }
  0x8b   :  { %1131 = vmatpush1.bf16.msra.mxu1 %v1994_v54  ;;  %728 = vmatprep.mubr.bf16.mxu0 %v2006_v62 }
  0x8c   :  { %1132 = vmatprep.subr.bf16.mxu1 %v1997_v55  ;;  %1888 = vmatprep.mubr.bf16.mxu1 %v2008_v56 }
  0x8f   :  { %1133 = vmatpush1.bf16.msra.mxu1 %v1999_v59 }
  0x90   :  { %1134 = vmatprep.subr.bf16.mxu1 %v2000_v60 }
  0x92   :  { %729 = vmatmul.mubr.bf16.gmra.mrb[28].mxu0 %v2009_v63  ;;  %1889 = vmatmul.mubr.bf16.gmra.mrb[28].mxu1 %v2010_v58 }
  0x93   :  { %1135 = vmatpush1.bf16.msra.mxu1 %v2003_v61  ;;  %736 = vmatprep.mubr.bf16.mxu0 %v2012_v0 }
  0x94   :  { %1136 = vmatprep.subr.bf16.mxu1 %v2006_v62  ;;  %1892 = vmatprep.mubr.bf16.mxu1 %v2251_v19  ;;  %v2043_v19 = vld [vmem:[#allocation7 + $0x50] ss:$8 sps:$4 sm:$0xff]  }
  0x97   :  { %1137 = vmatpush1.bf16.msra.mxu1 %v2009_v63 }
  0x98   :  { %1138 = vmatprep.subr.bf16.mxu1 %v2012_v0 }
  0x9a   :  { %737 = vmatmul.mubr.bf16.gmra.mrb[32].mxu0 %v2014_v1  ;;  %1893 = vmatmul.mubr.bf16.gmra.mrb[32].mxu1 %v2267_v26 }
  0x9b   :  { %1139 = vmatpush1.bf16.msra.mxu1 %v2014_v1  ;;  %744 = vmatprep.mubr.bf16.mxu0 %v2017_v2 }
  0x9c   :  { %1140 = vmatprep.subr.bf16.mxu1 %v2017_v2  ;;  %1896 = vmatprep.mubr.bf16.mxu1 %v2278_v32 }
  0x9f   :  { %1141 = vmatpush1.bf16.msra.mxu1 %v2015_v3 }
  0xa0   :  { %1142 = vmatprep.subr.bf16.mxu1 %v2020_v4 }
  0xa2   :  { %745 = vmatmul.mubr.bf16.gmra.mrb[36].mxu0 %v2015_v3  ;;  %1897 = vmatmul.mubr.bf16.gmra.mrb[36].mxu1 %v2290_v38 }
  0xa3   :  { %1143 = vmatpush1.bf16.msra.mxu1 %v2018_v5  ;;  %752 = vmatprep.mubr.bf16.mxu0 %v2020_v4 }
  0xa4   :  { %1144 = vmatprep.subr.bf16.mxu1 %v2024_v6  ;;  %1900 = vmatprep.mubr.bf16.mxu1 %v2297_v44 }
  0xa7   :  { %1145 = vmatpush1.bf16.msra.mxu1 %v2022_v7 }
  0xa8   :  { %1146 = vmatprep.subr.bf16.mxu1 %v2247_v12  ;;  %v2032_v12 = vld [vmem:[#allocation7 + $0x24] ss:$8 sps:$4 sm:$0xff]  }
  0xaa   :  { %753 = vmatmul.mubr.bf16.gmra.mrb[40].mxu0 %v2018_v5  ;;  %1901 = vmatmul.mubr.bf16.gmra.mrb[40].mxu1 %v2302_v48 }
  0xab   :  { %1147 = vmatpush1.bf16.msra.mxu1 %v2255_v21  ;;  %760 = vmatprep.mubr.bf16.mxu0 %v2024_v6  ;;  %v2046_v21 = vld [vmem:[#allocation7 + $0x60] ss:$8 sps:$4 sm:$0xff]  }
  0xac   :  { %1148 = vmatprep.subr.bf16.mxu1 %v2262_v25  ;;  %1904 = vmatprep.mubr.bf16.mxu1 %v2308_v52 }
  0xaf   :  { %1149 = vmatpush1.bf16.msra.mxu1 %v2272_v28 }
  0xb0   :  { %1150 = vmatprep.subr.bf16.mxu1 %v2283_v34 }
  0xb2   :  { %761 = vmatmul.mubr.bf16.gmra.mrb[44].mxu0 %v2022_v7  ;;  %1905 = vmatmul.mubr.bf16.gmra.mrb[44].mxu1 %v2315_v57 }
  0xb3   :  { %1151 = vmatpush1.bf16.msra.mxu1 %v2292_v39  ;;  %1154 = vmatprep.mubr.bf16.mxu1 %v2028_v8 }
  0xb4   :  { %1152 = vmatprep.subr.bf16.mxu1 %v2295_v43  ;;  %1267 = vmatprep.mubr.bf16.mxu0 %v2028_v8 }
  0xb7   :  { %1153 = vmatpush1.bf16.msra.mxu1 %v2304_v49 }
  0xba   :  { %1155 = vmatmul.mubr.bf16.vlgmr.msra.gmra.mrb[48].mxu1 %v2026_v9  ;;  %1268 = vmatmul.mubr.bf16.vlgmr.msra.gmra.mrb[48].mxu0 %v2026_v9 }
  0xbb   :  { %1164 = vmatprep.mubr.bf16.mxu1 %v2029_v10  ;;  %1275 = vmatprep.mubr.bf16.mxu0 %v2029_v10 }
  0xc2   :  { %1165 = vmatmul.mubr.bf16.gmra.mrb[52].mxu1 %v2031_v11  ;;  %1276 = vmatmul.mubr.bf16.gmra.mrb[52].mxu0 %v2031_v11 }
  0xc3   :  { %1174 = vmatprep.mubr.bf16.mxu1 %v2032_v12  ;;  %1283 = vmatprep.mubr.bf16.mxu0 %v2032_v12 }
  0xca   :  { %1175 = vmatmul.mubr.bf16.gmra.mrb[56].mxu1 %v2034_v13  ;;  %1284 = vmatmul.mubr.bf16.gmra.mrb[56].mxu0 %v2034_v13 }
  0xcb   :  { %1184 = vmatprep.mubr.bf16.mxu1 %v2035_v14  ;;  %1291 = vmatprep.mubr.bf16.mxu0 %v2035_v14 }
  0xd2   :  { %1185 = vmatmul.mubr.bf16.gmra.mrb[60].mxu1 %v2037_v15  ;;  %1292 = vmatmul.mubr.bf16.gmra.mrb[60].mxu0 %v2037_v15 }
  0xd3   :  { %1194 = vmatprep.mubr.bf16.mxu1 %v2038_v16  ;;  %1299 = vmatprep.mubr.bf16.mxu0 %v2038_v16 }
  0xda   :  { %1195 = vmatmul.mubr.bf16.gmra.mrb[64].mxu1 %v2040_v17  ;;  %1300 = vmatmul.mubr.bf16.gmra.mrb[64].mxu0 %v2040_v17 }
  0xdb   :  { %1204 = vmatprep.mubr.bf16.mxu1 %v2041_v18  ;;  %1307 = vmatprep.mubr.bf16.mxu0 %v2041_v18 }
  0xe2   :  { %1205 = vmatmul.mubr.bf16.gmra.mrb[68].mxu1 %v2043_v19  ;;  %1308 = vmatmul.mubr.bf16.gmra.mrb[68].mxu0 %v2043_v19 }
  0xe3   :  { %1214 = vmatprep.mubr.bf16.mxu1 %v2044_v20  ;;  %1315 = vmatprep.mubr.bf16.mxu0 %v2044_v20 }
  0xea   :  { %1215 = vmatmul.mubr.bf16.gmra.mrb[72].mxu1 %v2046_v21  ;;  %1316 = vmatmul.mubr.bf16.gmra.mrb[72].mxu0 %v2046_v21 }
  0xeb   :  { %1224 = vmatprep.mubr.bf16.mxu1 %v2047_v22  ;;  %1323 = vmatprep.mubr.bf16.mxu0 %v2047_v22 }
  0xf2   :  { %1225 = vmatmul.mubr.bf16.gmra.mrb[76].mxu1 %v2049_v23  ;;  %1324 = vmatmul.mubr.bf16.gmra.mrb[76].mxu0 %v2049_v23 }
 0x12d   :  { %v1676_v24 = vpop.f32.mrb[0].mxu0  ;;  %v1748_v25 = vpop.f32.mrb[0].mxu1 }
 0x12e   :  { %v1677_v26 = vpop.f32.mrb[1].mxu0  ;;  %v1749_v27 = vpop.f32.mrb[1].mxu1 }
 0x12f   :  { %v1678_v28 = vadd.f32 %v1677_v26, %v1676_v24  ;;  %v2337_v29 = vadd.f32 %v1749_v27, %v1748_v25  ;;  %v1679_v30 = vpop.f32.mrb[2].mxu0  ;;  %v1751_v31 = vpop.f32.mrb[2].mxu1 }
 0x130   :  { %v1680_v32 = vpop.f32.mrb[3].mxu0  ;;  %v1752_v33 = vpop.f32.mrb[3].mxu1 }
 0x131   :  { %v1681_v34 = vadd.f32 %v1680_v32, %v1679_v30  ;;  %v2339_v35 = vadd.f32 %v1752_v33, %v1751_v31 }
 0x135   :  { %v1682_v36 = vpop.f32.mrb[4].mxu0  ;;  %v1754_v37 = vpop.f32.mrb[4].mxu1 }
 0x136   :  { %v1683_v38 = vpop.f32.mrb[5].mxu0  ;;  %v1755_v39 = vpop.f32.mrb[5].mxu1 }
 0x137   :  { %v1684_v40 = vadd.f32 %v1683_v38, %v1682_v36  ;;  %v2341_v41 = vadd.f32 %v1755_v39, %v1754_v37  ;;  %v1685_v42 = vpop.f32.mrb[6].mxu0  ;;  %v1757_v43 = vpop.f32.mrb[6].mxu1 }
 0x138   :  { %v1686_v44 = vpop.f32.mrb[7].mxu0  ;;  %v1758_v45 = vpop.f32.mrb[7].mxu1 }
 0x139   :  { %v1687_v46 = vadd.f32 %v1686_v44, %v1685_v42  ;;  %v2343_v47 = vadd.f32 %v1758_v45, %v1757_v43 }
 0x13d   :  { %v1688_v48 = vpop.f32.mrb[8].mxu0  ;;  %v1760_v49 = vpop.f32.mrb[8].mxu1 }
 0x13e   :  { %v1689_v50 = vpop.f32.mrb[9].mxu0  ;;  %v1761_v51 = vpop.f32.mrb[9].mxu1 }
 0x13f   :  { %v1690_v52 = vadd.f32 %v1689_v50, %v1688_v48  ;;  %v2345_v53 = vadd.f32 %v1761_v51, %v1760_v49  ;;  %v1691_v54 = vpop.f32.mrb[10].mxu0  ;;  %v1763_v55 = vpop.f32.mrb[10].mxu1 }
 0x140   :  { %v1692_v56 = vpop.f32.mrb[11].mxu0  ;;  %v1764_v57 = vpop.f32.mrb[11].mxu1 }
 0x141   :  { %v1693_v58 = vadd.f32 %v1692_v56, %v1691_v54  ;;  %v2347_v59 = vadd.f32 %v1764_v57, %v1763_v55 }
 0x145   :  { %v1694_v60 = vpop.f32.mrb[12].mxu0  ;;  %v1766_v61 = vpop.f32.mrb[12].mxu1 }
 0x146   :  { %v1695_v62 = vpop.f32.mrb[13].mxu0  ;;  %v1767_v63 = vpop.f32.mrb[13].mxu1 }
 0x147   :  { %v1696_v0 = vadd.f32 %v1695_v62, %v1694_v60  ;;  %v2349_v1 = vadd.f32 %v1767_v63, %v1766_v61  ;;  %v1697_v2 = vpop.f32.mrb[14].mxu0  ;;  %v1769_v3 = vpop.f32.mrb[14].mxu1 }
 0x148   :  { %v1698_v4 = vpop.f32.mrb[15].mxu0  ;;  %v1770_v5 = vpop.f32.mrb[15].mxu1 }
 0x149   :  { %v1699_v6 = vadd.f32 %v1698_v4, %v1697_v2  ;;  %v2351_v7 = vadd.f32 %v1770_v5, %v1769_v3 }
 0x14d   :  { %v1700_v8 = vpop.f32.mrb[16].mxu0  ;;  %v1878_v9 = vpop.f32.mrb[16].mxu1 }
 0x14e   :  { %v844_v10 = vadd.f32 %v1878_v9, %v1684_v40  ;;  %v1701_v11 = vpop.f32.mrb[17].mxu0  ;;  %v835_v12 = vpop.f32.mrb[17].mxu1 }
 0x14f   :  { %v1702_v13 = vadd.f32 %v1701_v11, %v1700_v8  ;;  %v836_v14 = vadd.f32 %v1678_v28, %v835_v12  ;;  %v1703_v15 = vpop.f32.mrb[18].mxu0  ;;  %v1879_v16 = vpop.f32.mrb[18].mxu1 }
 0x150   :  { %v847_v17 = vadd.f32 %v1879_v16, %v1687_v46  ;;  %v1704_v18 = vpop.f32.mrb[19].mxu0  ;;  %v838_v19 = vpop.f32.mrb[19].mxu1  ;;  %996 = vst [vmem:[#allocation8 + $0x10] sm:$0xff] %v844_v10 }
 0x151   :  { %v1705_v20 = vadd.f32 %v1704_v18, %v1703_v15  ;;  %v839_v21 = vadd.f32 %v1681_v34, %v838_v19  ;;  %994 = vst [vmem:[#allocation8] sm:$0xff] %v836_v14 }
 0x152   :  { %997 = vst [vmem:[#allocation8 + $0x18] sm:$0xff] %v847_v17 }
 0x153   :  { %995 = vst [vmem:[#allocation8 + $0x8] sm:$0xff] %v839_v21 }
 0x155   :  { %v1706_v22 = vpop.f32.mrb[20].mxu0  ;;  %v1882_v23 = vpop.f32.mrb[20].mxu1 }
 0x156   :  { %v860_v24 = vadd.f32 %v1882_v23, %v1696_v0  ;;  %v1707_v25 = vpop.f32.mrb[21].mxu0  ;;  %v851_v26 = vpop.f32.mrb[21].mxu1 }
 0x157   :  { %v1708_v27 = vadd.f32 %v1707_v25, %v1706_v22  ;;  %v852_v30 = vadd.f32 %v1690_v52, %v851_v26  ;;  %v1709_v31 = vpop.f32.mrb[22].mxu0  ;;  %v1883_v28 = vpop.f32.mrb[22].mxu1 }
 0x158   :  { %v863_v32 = vadd.f32 %v1883_v28, %v1699_v6  ;;  %v1710_v33 = vpop.f32.mrb[23].mxu0  ;;  %v854_v36 = vpop.f32.mrb[23].mxu1  ;;  %1000 = vst [vmem:[#allocation8 + $0x30] sm:$0xff] %v860_v24 }
 0x159   :  { %v1711_v37 = vadd.f32 %v1710_v33, %v1709_v31  ;;  %v855_v38 = vadd.f32 %v1693_v58, %v854_v36  ;;  %998 = vst [vmem:[#allocation8 + $0x20] sm:$0xff] %v852_v30 }
 0x15a   :  { %1001 = vst [vmem:[#allocation8 + $0x38] sm:$0xff] %v863_v32 }
 0x15b   :  { %999 = vst [vmem:[#allocation8 + $0x28] sm:$0xff] %v855_v38 }
 0x15d   :  { %v1712_v34 = vpop.f32.mrb[24].mxu0  ;;  %v1886_v39 = vpop.f32.mrb[24].mxu1 }
 0x15e   :  { %v876_v40 = vadd.f32 %v1886_v39, %v1708_v27  ;;  %v1713_v42 = vpop.f32.mrb[25].mxu0  ;;  %v867_v43 = vpop.f32.mrb[25].mxu1 }
 0x15f   :  { %v1714_v44 = vadd.f32 %v1713_v42, %v1712_v34  ;;  %v868_v45 = vadd.f32 %v1702_v13, %v867_v43  ;;  %v1715_v46 = vpop.f32.mrb[26].mxu0  ;;  %v1887_v48 = vpop.f32.mrb[26].mxu1 }
 0x160   :  { %v879_v49 = vadd.f32 %v1887_v48, %v1711_v37  ;;  %v1716_v50 = vpop.f32.mrb[27].mxu0  ;;  %v870_v51 = vpop.f32.mrb[27].mxu1  ;;  %1004 = vst [vmem:[#allocation8 + $0x50] sm:$0xff] %v876_v40 }
 0x161   :  { %v1717_v52 = vadd.f32 %v1716_v50, %v1715_v46  ;;  %v871_v54 = vadd.f32 %v1705_v20, %v870_v51  ;;  %1002 = vst [vmem:[#allocation8 + $0x40] sm:$0xff] %v868_v45 }
 0x162   :  { %1005 = vst [vmem:[#allocation8 + $0x58] sm:$0xff] %v879_v49 }
 0x163   :  { %1003 = vst [vmem:[#allocation8 + $0x48] sm:$0xff] %v871_v54 }
 0x165   :  { %v1718_v55 = vpop.f32.mrb[28].mxu0  ;;  %v1890_v56 = vpop.f32.mrb[28].mxu1 }
 0x166   :  { %v1719_v57 = vpop.f32.mrb[29].mxu0  ;;  %v883_v58 = vpop.f32.mrb[29].mxu1 }
 0x167   :  { %v1720_v60 = vadd.f32 %v1719_v57, %v1718_v55  ;;  %v884_v61 = vadd.f32 %v1714_v44, %v883_v58  ;;  %v1721_v62 = vpop.f32.mrb[30].mxu0  ;;  %v1891_v63 = vpop.f32.mrb[30].mxu1 }
 0x168   :  { %v1722_v0 = vpop.f32.mrb[31].mxu0  ;;  %v886_v2 = vpop.f32.mrb[31].mxu1 }
 0x169   :  { %v892_v3 = vadd.f32 %v1890_v56, %v1720_v60  ;;  %v1723_v4 = vadd.f32 %v1722_v0, %v1721_v62  ;;  %v887_v5 = vadd.f32 %v1717_v52, %v886_v2  ;;  %1006 = vst [vmem:[#allocation8 + $0x60] sm:$0xff] %v884_v61 }
 0x16b   :  { %v895_v6 = vadd.f32 %v1891_v63, %v1723_v4  ;;  %1008 = vst [vmem:[#allocation8 + $0x70] sm:$0xff] %v892_v3  ;;  %1007 = vst [vmem:[#allocation8 + $0x68] sm:$0xff] %v887_v5 }
 0x16d   :  { %v1724_v8 = vpop.f32.mrb[32].mxu0  ;;  %v1894_v9 = vpop.f32.mrb[32].mxu1  ;;  %1009 = vst [vmem:[#allocation8 + $0x78] sm:$0xff] %v895_v6 }
 0x16e   :  { %v1725_v10 = vpop.f32.mrb[33].mxu0  ;;  %v899_v11 = vpop.f32.mrb[33].mxu1 }
 0x16f   :  { %v1726_v12 = vadd.f32 %v1725_v10, %v1724_v8  ;;  %v1727_v13 = vpop.f32.mrb[34].mxu0  ;;  %v1895_v14 = vpop.f32.mrb[34].mxu1 }
 0x170   :  { %v1728_v15 = vpop.f32.mrb[35].mxu0  ;;  %v902_v16 = vpop.f32.mrb[35].mxu1 }
 0x171   :  { %v900_v17 = vadd.f32 %v1726_v12, %v899_v11  ;;  %v1729_v18 = vadd.f32 %v1728_v15, %v1727_v13 }
 0x173   :  { %v903_v19 = vadd.f32 %v1729_v18, %v902_v16  ;;  %1010 = vst [vmem:[#allocation8 + $0x80] sm:$0xff] %v900_v17 }
 0x175   :  { %v1730_v20 = vpop.f32.mrb[36].mxu0  ;;  %v1898_v21 = vpop.f32.mrb[36].mxu1  ;;  %1011 = vst [vmem:[#allocation8 + $0x88] sm:$0xff] %v903_v19 }
 0x176   :  { %v1731_v22 = vpop.f32.mrb[37].mxu0  ;;  %v915_v23 = vpop.f32.mrb[37].mxu1 }
 0x177   :  { %v1732_v24 = vadd.f32 %v1731_v22, %v1730_v20  ;;  %v1733_v25 = vpop.f32.mrb[38].mxu0  ;;  %v1899_v26 = vpop.f32.mrb[38].mxu1 }
 0x178   :  { %v1734_v27 = vpop.f32.mrb[39].mxu0  ;;  %v918_v30 = vpop.f32.mrb[39].mxu1 }
 0x179   :  { %v908_v31 = vadd.f32 %v1894_v9, %v1732_v24  ;;  %v1735_v28 = vadd.f32 %v1734_v27, %v1733_v25 }
 0x17b   :  { %v911_v32 = vadd.f32 %v1895_v14, %v1735_v28  ;;  %1012 = vst [vmem:[#allocation8 + $0x90] sm:$0xff] %v908_v31 }
 0x17d   :  { %v1736_v33 = vpop.f32.mrb[40].mxu0  ;;  %v1902_v36 = vpop.f32.mrb[40].mxu1  ;;  %1013 = vst [vmem:[#allocation8 + $0x98] sm:$0xff] %v911_v32 }
 0x17e   :  { %v940_v37 = vadd.f32 %v1902_v36, %v2341_v41  ;;  %v1737_v38 = vpop.f32.mrb[41].mxu0  ;;  %v931_v34 = vpop.f32.mrb[41].mxu1 }
 0x17f   :  { %v1738_v39 = vadd.f32 %v1737_v38, %v1736_v33  ;;  %v932_v40 = vadd.f32 %v2337_v29, %v931_v34  ;;  %v1739_v42 = vpop.f32.mrb[42].mxu0  ;;  %v1903_v43 = vpop.f32.mrb[42].mxu1 }
 0x180   :  { %v943_v44 = vadd.f32 %v1903_v43, %v2343_v47  ;;  %v1740_v45 = vpop.f32.mrb[43].mxu0  ;;  %v934_v46 = vpop.f32.mrb[43].mxu1  ;;  %1020 = vst [vmem:[#allocation8 + $0xd0] sm:$0xff] %v940_v37 }
 0x181   :  { %v916_v48 = vadd.f32 %v1738_v39, %v915_v23  ;;  %v1741_v49 = vadd.f32 %v1740_v45, %v1739_v42  ;;  %v935_v50 = vadd.f32 %v2339_v35, %v934_v46  ;;  %1018 = vst [vmem:[#allocation8 + $0xc0] sm:$0xff] %v932_v40 }
 0x182   :  { %1021 = vst [vmem:[#allocation8 + $0xd8] sm:$0xff] %v943_v44 }
 0x183   :  { %v919_v51 = vadd.f32 %v1741_v49, %v918_v30  ;;  %1014 = vst [vmem:[#allocation8 + $0xa0] sm:$0xff] %v916_v48  ;;  %1019 = vst [vmem:[#allocation8 + $0xc8] sm:$0xff] %v935_v50 }
 0x185   :  { %v1742_v41 = vpop.f32.mrb[44].mxu0  ;;  %v1906_v52 = vpop.f32.mrb[44].mxu1  ;;  %1015 = vst [vmem:[#allocation8 + $0xa8] sm:$0xff] %v919_v51 }
 0x186   :  { %v956_v29 = vadd.f32 %v1906_v52, %v2349_v1  ;;  %v1743_v54 = vpop.f32.mrb[45].mxu0  ;;  %v947_v55 = vpop.f32.mrb[45].mxu1 }
 0x187   :  { %v1744_v47 = vadd.f32 %v1743_v54, %v1742_v41  ;;  %v948_v56 = vadd.f32 %v2345_v53, %v947_v55  ;;  %v1745_v57 = vpop.f32.mrb[46].mxu0  ;;  %v1907_v58 = vpop.f32.mrb[46].mxu1 }
 0x188   :  { %v959_v35 = vadd.f32 %v1907_v58, %v2351_v7  ;;  %v1746_v60 = vpop.f32.mrb[47].mxu0  ;;  %v950_v61 = vpop.f32.mrb[47].mxu1  ;;  %1024 = vst [vmem:[#allocation8 + $0xf0] sm:$0xff] %v956_v29 }
 0x189   :  { %v924_v62 = vadd.f32 %v1898_v21, %v1744_v47  ;;  %v1747_v63 = vadd.f32 %v1746_v60, %v1745_v57  ;;  %v951_v0 = vadd.f32 %v2347_v59, %v950_v61  ;;  %1022 = vst [vmem:[#allocation8 + $0xe0] sm:$0xff] %v948_v56 }
 0x18a   :  { %1025 = vst [vmem:[#allocation8 + $0xf8] sm:$0xff] %v959_v35 }
 0x18b   :  { %v927_v1 = vadd.f32 %v1899_v26, %v1747_v63  ;;  %1016 = vst [vmem:[#allocation8 + $0xb0] sm:$0xff] %v924_v62  ;;  %1023 = vst [vmem:[#allocation8 + $0xe8] sm:$0xff] %v951_v0 }
 0x18d   :  { %v1156_v2 = vpop.f32.mrb[48].mxu1  ;;  %v1812_v53 = vpop.f32.mrb[48].mxu0  ;;  %1017 = vst [vmem:[#allocation8 + $0xb8] sm:$0xff] %v927_v1 }
 0x18e   :  { %1339 = vst [vmem:[#allocation9] sm:$0xff] %v1156_v2  ;;  %v1158_v3 = vpop.f32.mrb[49].mxu1  ;;  %v1813_v7 = vpop.f32.mrb[49].mxu0 }
 0x18f   :  { %1340 = vst [vmem:[#allocation9 + $0x8] sm:$0xff] %v1158_v3  ;;  %v1814_v4 = vadd.f32 %v1813_v7, %v1812_v53  ;;  %v1160_v5 = vpop.f32.mrb[50].mxu1  ;;  %v1815_v6 = vpop.f32.mrb[50].mxu0 }
 0x190   :  { %1342 = vst [vmem:[#allocation9 + $0x18] sm:$0xff] %v1160_v5  ;;  %v1162_v59 = vpop.f32.mrb[51].mxu1  ;;  %v1816_v8 = vpop.f32.mrb[51].mxu0 }
 0x191   :  { %2127 = shalt.err (!%p2124_p0)
}
 0x192   :  { %s2128_s7 = scalar_lea.hbm %s2391_s3, 4096 }
 0x193   :  { %p2129_p1 = scmp.ne.s32.totalorder %s2391_s3, %s2128_s7  ;;  %p2132_p2 = scmp.lt.u32.totalorder %s2128_s7, %s2391_s3 }
 0x195   :  { %p2134_p3 = pnand %p2132_p2, %p2129_p1 }
 0x197   :  { %2137 = shalt.err (!%p2134_p3)
}
 0x198   :  { %1549 = dma.vmem_to_hbm [thread:$0]  %s1544_s29, 4096, %s2391_s3, [#allocation4], %s2175_s0, %s2175_s0, %s2176_s26   ;;  %1341 = vst [vmem:[#allocation9 + $0x10] sm:$0xff] %v1814_v4  ;;  %1343 = vst [vmem:[#allocation9 + $0x20] sm:$0xff] %v1162_v59  ;;  %v1817_v9 = vadd.f32 %v1816_v8, %v1815_v6  ;;  %v1166_v10 = vpop.f32.mrb[52].mxu1  ;;  %v1818_v11 = vpop.f32.mrb[52].mxu0 }
 0x199   :  { %1345 = vst [vmem:[#allocation9 + $0x30] sm:$0xff] %v1166_v10  ;;  %v1168_v12 = vpop.f32.mrb[53].mxu1  ;;  %v1819_v13 = vpop.f32.mrb[53].mxu0  ;;  %s2178_s3 = smov [#allocation9]  }
 0x19a   :  { %1344 = vst [vmem:[#allocation9 + $0x28] sm:$0xff] %v1817_v9  ;;  %1346 = vst [vmem:[#allocation9 + $0x38] sm:$0xff] %v1168_v12  ;;  %v1820_v14 = vadd.f32 %v1819_v13, %v1818_v11  ;;  %v1170_v15 = vpop.f32.mrb[54].mxu1  ;;  %v1821_v16 = vpop.f32.mrb[54].mxu0  ;;  %s1555_s13 = sshll.u32 %s2178_s3, 4  ;;  %s1556_s13 = int_to_ptr.vmem [resolvable:$true] %s1555_s13 }
 0x19b   :  { %1348 = vst [vmem:[#allocation9 + $0x48] sm:$0xff] %v1170_v15  ;;  %v1172_v17 = vpop.f32.mrb[55].mxu1  ;;  %v1822_v18 = vpop.f32.mrb[55].mxu0  ;;  %s2138_s14 = scalar_lea.vmem %s1556_s13, 6144  ;;  %p2143_p5 = scmp.lt.s32.totalorder %s1556_s13, %s1556_s13 }
 0x19c   :  { %1347 = vst [vmem:[#allocation9 + $0x40] sm:$0xff] %v1820_v14  ;;  %1349 = vst [vmem:[#allocation9 + $0x50] sm:$0xff] %v1172_v17  ;;  %v1823_v19 = vadd.f32 %v1822_v18, %v1821_v16  ;;  %p2139_p4 = scmp.ne.s32.totalorder %s1556_s13, %s2138_s14  ;;  %p2144_p6 = scmp.lt.s32.totalorder %s2138_s14, %s2138_s14 }
 0x19d   :  { %v1176_v20 = vpop.f32.mrb[56].mxu1  ;;  %v1824_v21 = vpop.f32.mrb[56].mxu0 }
 0x19e   :  { %1350 = vst [vmem:[#allocation9 + $0x58] sm:$0xff] %v1823_v19  ;;  %1351 = vst [vmem:[#allocation9 + $0x60] sm:$0xff] %v1176_v20  ;;  %v1178_v22 = vpop.f32.mrb[57].mxu1  ;;  %v1825_v23 = vpop.f32.mrb[57].mxu0  ;;  %p2145_p7 = por %p2144_p6, %p2143_p5 }
 0x19f   :  { %1352 = vst [vmem:[#allocation9 + $0x68] sm:$0xff] %v1178_v22  ;;  %v1826_v24 = vadd.f32 %v1825_v23, %v1824_v21  ;;  %v1180_v25 = vpop.f32.mrb[58].mxu1  ;;  %v1827_v26 = vpop.f32.mrb[58].mxu0 }
 0x1a0   :  { %1354 = vst [vmem:[#allocation9 + $0x78] sm:$0xff] %v1180_v25  ;;  %v1182_v27 = vpop.f32.mrb[59].mxu1  ;;  %v1828_v30 = vpop.f32.mrb[59].mxu0  ;;  %p2146_p8 = pnand %p2145_p7, %p2139_p4 }
 0x1a1   :  { %1353 = vst [vmem:[#allocation9 + $0x70] sm:$0xff] %v1826_v24  ;;  %1355 = vst [vmem:[#allocation9 + $0x80] sm:$0xff] %v1182_v27  ;;  %v1829_v31 = vadd.f32 %v1828_v30, %v1827_v26 }
 0x1a3   :  { %1356 = vst [vmem:[#allocation9 + $0x88] sm:$0xff] %v1829_v31 }
 0x1a5   :  { %v1186_v28 = vpop.f32.mrb[60].mxu1  ;;  %v1830_v32 = vpop.f32.mrb[60].mxu0 }
 0x1a6   :  { %1357 = vst [vmem:[#allocation9 + $0x90] sm:$0xff] %v1186_v28  ;;  %v1188_v33 = vpop.f32.mrb[61].mxu1  ;;  %v1831_v36 = vpop.f32.mrb[61].mxu0 }
 0x1a7   :  { %1358 = vst [vmem:[#allocation9 + $0x98] sm:$0xff] %v1188_v33  ;;  %v1832_v37 = vadd.f32 %v1831_v36, %v1830_v32  ;;  %v1190_v38 = vpop.f32.mrb[62].mxu1  ;;  %v1833_v34 = vpop.f32.mrb[62].mxu0 }
 0x1a8   :  { %1360 = vst [vmem:[#allocation9 + $0xa8] sm:$0xff] %v1190_v38  ;;  %v1192_v39 = vpop.f32.mrb[63].mxu1  ;;  %v1834_v40 = vpop.f32.mrb[63].mxu0 }
 0x1a9   :  { %1359 = vst [vmem:[#allocation9 + $0xa0] sm:$0xff] %v1832_v37  ;;  %1361 = vst [vmem:[#allocation9 + $0xb0] sm:$0xff] %v1192_v39  ;;  %v1835_v42 = vadd.f32 %v1834_v40, %v1833_v34 }
 0x1ab   :  { %1362 = vst [vmem:[#allocation9 + $0xb8] sm:$0xff] %v1835_v42 }
 0x1ad   :  { %v1196_v43 = vpop.f32.mrb[64].mxu1  ;;  %v1836_v44 = vpop.f32.mrb[64].mxu0 }
 0x1ae   :  { %1363 = vst [vmem:[#allocation9 + $0xc0] sm:$0xff] %v1196_v43  ;;  %v1198_v45 = vpop.f32.mrb[65].mxu1  ;;  %v1837_v46 = vpop.f32.mrb[65].mxu0 }
 0x1af   :  { %1364 = vst [vmem:[#allocation9 + $0xc8] sm:$0xff] %v1198_v45  ;;  %v1838_v48 = vadd.f32 %v1837_v46, %v1836_v44  ;;  %v1200_v49 = vpop.f32.mrb[66].mxu1  ;;  %v1839_v50 = vpop.f32.mrb[66].mxu0 }
 0x1b0   :  { %1366 = vst [vmem:[#allocation9 + $0xd8] sm:$0xff] %v1200_v49  ;;  %v1202_v51 = vpop.f32.mrb[67].mxu1  ;;  %v1840_v41 = vpop.f32.mrb[67].mxu0 }
 0x1b1   :  { %1365 = vst [vmem:[#allocation9 + $0xd0] sm:$0xff] %v1838_v48  ;;  %1367 = vst [vmem:[#allocation9 + $0xe0] sm:$0xff] %v1202_v51  ;;  %v1841_v52 = vadd.f32 %v1840_v41, %v1839_v50 }
 0x1b3   :  { %1368 = vst [vmem:[#allocation9 + $0xe8] sm:$0xff] %v1841_v52 }
 0x1b5   :  { %v1206_v29 = vpop.f32.mrb[68].mxu1  ;;  %v1842_v54 = vpop.f32.mrb[68].mxu0 }
 0x1b6   :  { %1369 = vst [vmem:[#allocation9 + $0xf0] sm:$0xff] %v1206_v29  ;;  %v1208_v55 = vpop.f32.mrb[69].mxu1  ;;  %v1843_v47 = vpop.f32.mrb[69].mxu0 }
 0x1b7   :  { %1370 = vst [vmem:[#allocation9 + $0xf8] sm:$0xff] %v1208_v55  ;;  %v1844_v56 = vadd.f32 %v1843_v47, %v1842_v54  ;;  %v1210_v57 = vpop.f32.mrb[70].mxu1  ;;  %v1845_v58 = vpop.f32.mrb[70].mxu0 }
 0x1b8   :  { %1372 = vst [vmem:[#allocation9 + $0x108] sm:$0xff] %v1210_v57  ;;  %v1212_v35 = vpop.f32.mrb[71].mxu1  ;;  %v1846_v60 = vpop.f32.mrb[71].mxu0 }
 0x1b9   :  { %1371 = vst [vmem:[#allocation9 + $0x100] sm:$0xff] %v1844_v56  ;;  %1373 = vst [vmem:[#allocation9 + $0x110] sm:$0xff] %v1212_v35  ;;  %v1847_v61 = vadd.f32 %v1846_v60, %v1845_v58 }
 0x1bb   :  { %1374 = vst [vmem:[#allocation9 + $0x118] sm:$0xff] %v1847_v61 }
 0x1bd   :  { %v1216_v62 = vpop.f32.mrb[72].mxu1  ;;  %v1848_v63 = vpop.f32.mrb[72].mxu0 }
 0x1be   :  { %1375 = vst [vmem:[#allocation9 + $0x120] sm:$0xff] %v1216_v62  ;;  %v1218_v0 = vpop.f32.mrb[73].mxu1  ;;  %v1849_v1 = vpop.f32.mrb[73].mxu0 }
 0x1bf   :  { %1376 = vst [vmem:[#allocation9 + $0x128] sm:$0xff] %v1218_v0  ;;  %v1850_v2 = vadd.f32 %v1849_v1, %v1848_v63  ;;  %v1220_v53 = vpop.f32.mrb[74].mxu1  ;;  %v1851_v3 = vpop.f32.mrb[74].mxu0 }
 0x1c0   :  { %1378 = vst [vmem:[#allocation9 + $0x138] sm:$0xff] %v1220_v53  ;;  %v1222_v7 = vpop.f32.mrb[75].mxu1  ;;  %v1852_v4 = vpop.f32.mrb[75].mxu0 }
 0x1c1   :  { %1377 = vst [vmem:[#allocation9 + $0x130] sm:$0xff] %v1850_v2  ;;  %1379 = vst [vmem:[#allocation9 + $0x140] sm:$0xff] %v1222_v7  ;;  %v1853_v5 = vadd.f32 %v1852_v4, %v1851_v3 }
 0x1c3   :  { %1380 = vst [vmem:[#allocation9 + $0x148] sm:$0xff] %v1853_v5 }
 0x1c5   :  { %v1226_v6 = vpop.f32.mrb[76].mxu1  ;;  %v1854_v59 = vpop.f32.mrb[76].mxu0 }
 0x1c6   :  { %1381 = vst [vmem:[#allocation9 + $0x150] sm:$0xff] %v1226_v6  ;;  %v1228_v8 = vpop.f32.mrb[77].mxu1  ;;  %v1855_v9 = vpop.f32.mrb[77].mxu0 }
 0x1c7   :  { %1382 = vst [vmem:[#allocation9 + $0x158] sm:$0xff] %v1228_v8  ;;  %v1856_v10 = vadd.f32 %v1855_v9, %v1854_v59  ;;  %v1230_v11 = vpop.f32.mrb[78].mxu1  ;;  %v1857_v12 = vpop.f32.mrb[78].mxu0 }
 0x1c8   :  { %1384 = vst [vmem:[#allocation9 + $0x168] sm:$0xff] %v1230_v11  ;;  %v1232_v13 = vpop.f32.mrb[79].mxu1  ;;  %v1858_v14 = vpop.f32.mrb[79].mxu0 }
 0x1c9   :  { %1383 = vst [vmem:[#allocation9 + $0x160] sm:$0xff] %v1856_v10  ;;  %1385 = vst [vmem:[#allocation9 + $0x170] sm:$0xff] %v1232_v13  ;;  %v1859_v15 = vadd.f32 %v1858_v14, %v1857_v12 }
 0x1cb   :  { %1386 = vst [vmem:[#allocation9 + $0x178] sm:$0xff] %v1859_v15 }
 0x1cc   :  { %2149 = shalt.err (!%p2146_p8)
}
 0x1cd   :  { %s2150_s17 = scalar_lea.hbm %s2392_s4, 6144 }
 0x1ce   :  { %p2151_p9 = scmp.ne.s32.totalorder %s2392_s4, %s2150_s17  ;;  %p2154_p10 = scmp.lt.u32.totalorder %s2150_s17, %s2392_s4 }
 0x1d0   :  { %p2156_p11 = pnand %p2154_p10, %p2151_p9 }
 0x1d2   :  { %2159 = shalt.err (!%p2156_p11)
}
 0x1d3   :  { %s2179_s22 = smov 384   ;;  %s2180_s23 = smov 24  }
 0x1d4   :  { %1561 = dma.vmem_to_hbm [thread:$0]  %s1556_s13, 6144, %s2392_s4, [#allocation10], %s2179_s22, %s2179_s22, %s2180_s23  }
 0x1d5   :  { %2164 = dma.done.wait [#allocation4], 4096  }
 0x1d6   :  { %2165 = vsyncadd [#allocation4], 4294963200 }
 0x1d7   :  { %2166 = dma.done.wait [#allocation10], 6144  }
 0x1d8   :  { %2167 = vsyncadd [#allocation10], 4294961152 }
 0x1d9   :  { %1568 = vsyncpa [#allocation3], 1 }
 0x1da   :  { %1569 = vsyncpa [#allocation6], 1 }
 0x1db   :  { %1570 = vsyncpa [#allocation4], 1 }
 0x1dc   :  { %1571 = vsyncpa [#allocation10], 1 }

</bundles_post_ra>
